<compile_context>
chip_gen: v6e
topology: v6e:2x2x1
jax: 0.10.0
libtpu: 0.0.40
codegen_flags: <defaults>
</compile_context>

<pallas_src>
import jax
import jax.numpy as jnp
from jax.experimental import pallas as pl
from jax.experimental.pallas import tpu as pltpu


def _round_up(x, m):
    return ((x + m - 1) // m) * m


def _dense_kernel(x_ref, w_ref, b_ref, o_ref):
    # x_ref: [TM, H] f32 (streamed)   w_ref: [H, P] bf16 (resident, 1-buffered)
    # b_ref: [1, P]  f32 (resident)   o_ref: [TM, P] f32 (streamed)
    x_bf16 = x_ref[...].astype(jnp.bfloat16)          # VPU cast, hides under MXU
    acc = jnp.dot(x_bf16, w_ref[...], preferred_element_type=jnp.float32)
    o_ref[...] = (acc + b_ref[...]).astype(o_ref.dtype)


def prepare_decoder_params(weight, bias):
    """One-time (per model) parameter prep: bf16 weight, f32 row-vector bias."""
    return weight.astype(jnp.bfloat16), bias.astype(jnp.float32).reshape(1, -1)


def _choose_tile_m(M, tile_m):
    # Prefer >= 2 grid blocks along the "parallel" M axis (v7x has 2 TCs),
    # while keeping the block sublane-aligned (multiple of 8) and capped at
    # tile_m so per-step VMEM stays modest.
    tm = min(tile_m, _round_up(pl.cdiv(M, 2), 8))
    return max(tm, 8)


def decoder_forward(conditioning, weight, bias, *, tile_m=1024):
    """Pallas equivalent of Decoder.forward (decode = dense projection).

    conditioning: [B, T, H] float32
    weight:       [H, P]    float32 or bfloat16 (pass prepare_decoder_params
                            output to skip the per-call cast)
    bias:         [P] or [1, P] float32
    returns:      [B, T, P] float32
    """
    B, T, H = conditioning.shape
    P = weight.shape[-1]
    M = B * T

    # NOTE: for tiny problems (M*H*P << 1e6) a plain jnp.einsum is faster than
    # the pallas_call launch; callers may dispatch on size.  The kernel path is
    # always taken here so the Pallas code is exercised.

    if weight.dtype != jnp.bfloat16:
        w_bf16 = weight.astype(jnp.bfloat16)
    else:
        w_bf16 = weight
    b_f32 = bias.astype(jnp.float32).reshape(1, P)

    x2d = conditioning.reshape(M, H).astype(jnp.float32)

    TM = _choose_tile_m(M, tile_m)
    grid_m = pl.cdiv(M, TM)          # ragged last block: OOB rows never stored

    cost = pl.CostEstimate(
        flops=2 * M * H * P,
        bytes_accessed=4 * M * H + 2 * H * P + 4 * P + 4 * M * P,
        transcendentals=0,
    )

    out2d = pl.pallas_call(
        _dense_kernel,
        out_shape=jax.ShapeDtypeStruct((M, P), jnp.float32),
        grid_spec=pltpu.PrefetchScalarGridSpec(
            num_scalar_prefetch=0,
            grid=(grid_m,),
            in_specs=[
                # Streaming activation tile (double-buffered by default).
                pl.BlockSpec((TM, H), lambda i: (i, 0)),
                # Resident weight / bias: constant index_map -> single buffer.
                pl.BlockSpec((H, P), lambda i: (0, 0),
                             pipeline_mode=pl.Buffered(1)),
                pl.BlockSpec((1, P), lambda i: (0, 0),
                             pipeline_mode=pl.Buffered(1)),
            ],
            out_specs=pl.BlockSpec((TM, P), lambda i: (i, 0)),
        ),
        compiler_params=pltpu.CompilerParams(
            dimension_semantics=("parallel",),      # shard M across TCs (v7x)
            vmem_limit_bytes=48 * 1024 * 1024,      # safe on v5e/v6e/v7x
        ),
        cost_estimate=cost,
    )(x2d, w_bf16, b_f32)

    return out2d.astype(conditioning.dtype).reshape(B, T, P)


if __name__ == "__main__":
    # Small shapes consistent with a DDSP decoder: batch=2, seq=8, hidden=32,
    # param_size=16.
    B, T, H, PARAM_SIZE = 2, 8, 32, 16

    key = jax.random.PRNGKey(0)
    k_cond, k_w, k_b = jax.random.split(key, 3)

    conditioning = jax.random.normal(k_cond, (B, T, H), dtype=jnp.float32)
    # Deterministic parameter init (synthetic — no checkpoint load).
    weight = jax.random.normal(k_w, (H, PARAM_SIZE), dtype=jnp.float32) * 0.05
    bias = jax.random.normal(k_b, (PARAM_SIZE,), dtype=jnp.float32) * 0.01

    # One-time parameter prep (hoisted out of the per-call path).
    w_bf16, b_f32 = prepare_decoder_params(weight, bias)

    out = decoder_forward(conditioning, w_bf16, b_f32)
    jax.block_until_ready(out)

    # Sanity checks against plain-JAX references.
    # f32 reference (loose tolerance: kernel uses bf16 MXU inputs, f32 accum).
    ref_f32 = (conditioning.reshape(B * T, H) @ weight + bias).reshape(
        B, T, PARAM_SIZE)
    # bf16-input reference (same numerics as the kernel path).
    ref_bf16 = (
        jnp.dot(conditioning.reshape(B * T, H).astype(jnp.bfloat16),
                weight.astype(jnp.bfloat16),
                preferred_element_type=jnp.float32)
        + bias
    ).reshape(B, T, PARAM_SIZE)

    assert out.shape == (B, T, PARAM_SIZE)
    assert jnp.allclose(out, ref_f32, atol=2e-2, rtol=2e-2)
    assert jnp.allclose(out, ref_bf16, atol=1e-3, rtol=1e-3)

    print("KERNEL_OK")
</pallas_src>

<mosaic_0001>
module attributes {stable_mosaic.version = 11 : i64} {
  func.func @_dense_kernel(%arg0: i32, %arg1: memref<8x32xf32, #tpu.memory_space<vmem>>, %arg2: memref<32x16xbf16, #tpu.memory_space<vmem>>, %arg3: memref<1x16xf32, #tpu.memory_space<vmem>>, %arg4: memref<8x16xf32, #tpu.memory_space<vmem>>) attributes {dimension_semantics = [#tpu.dimension_semantics<parallel>], iteration_bounds = array<i64: 2>, scalar_prefetch = 0 : i64, scratch_operands = 0 : i64, tpu.core_type = #tpu.core_type<tc>, window_params = [{transform_indices = @transform_0, window_bounds = array<i64: 8, 32>}, {pipeline_mode = #tpu.pipeline_mode<synchronous>, transform_indices = @transform_1, window_bounds = array<i64: 32, 16>}, {pipeline_mode = #tpu.pipeline_mode<synchronous>, transform_indices = @transform_2, window_bounds = array<i64: 1, 16>}, {transform_indices = @transform_3, window_bounds = array<i64: 8, 16>}]} {
    %c0 = arith.constant 0 : index
    %c0_0 = arith.constant 0 : index
    %0 = vector.load %arg1[%c0, %c0_0] : memref<8x32xf32, #tpu.memory_space<vmem>>, vector<8x32xf32>
    %1 = arith.truncf %0 : vector<8x32xf32> to vector<8x32xbf16>
    %c0_1 = arith.constant 0 : index
    %c0_2 = arith.constant 0 : index
    %2 = vector.load %arg2[%c0_1, %c0_2] : memref<32x16xbf16, #tpu.memory_space<vmem>>, vector<32x16xbf16>
    %cst = arith.constant dense<0.000000e+00> : vector<8x16xf32>
    %3 = tpu.matmul %1, %2, %cst {dimension_numbers = #tpu.dot_dimension_numbers<[1], [0], [0], [1], [0, 0, 1, 1], [], []>} : vector<8x32xbf16>, vector<32x16xbf16>, vector<8x16xf32> -> vector<8x16xf32>
    %c0_3 = arith.constant 0 : index
    %c0_4 = arith.constant 0 : index
    %4 = vector.load %arg3[%c0_3, %c0_4] : memref<1x16xf32, #tpu.memory_space<vmem>>, vector<1x16xf32>
    %5 = vector.broadcast %4 : vector<1x16xf32> to vector<8x16xf32>
    %6 = arith.addf %3, %5 : vector<8x16xf32>
    %c0_5 = arith.constant 0 : index
    %c0_6 = arith.constant 0 : index
    %7 = vector.load %arg4[%c0_5, %c0_6] : memref<8x16xf32, #tpu.memory_space<vmem>>, vector<8x16xf32>
    tpu.vector_store %arg4[%c0_5, %c0_6], %6 {strides = array<i32>} : memref<8x16xf32, #tpu.memory_space<vmem>>, vector<8x16xf32>,
    return
  }
  func.func @transform_0(%arg0: i32) -> (i32, i32) {
    %c0_i32 = arith.constant 0 : i32
    %c0_i32_0 = arith.constant 0 : i32
    return %arg0, %c0_i32 : i32, i32
  }
  func.func @transform_1(%arg0: i32) -> (i32, i32) {
    %c0_i32 = arith.constant 0 : i32
    %c0_i32_0 = arith.constant 0 : i32
    %c0_i32_1 = arith.constant 0 : i32
    return %c0_i32, %c0_i32_0 : i32, i32
  }
  func.func @transform_2(%arg0: i32) -> (i32, i32) {
    %c0_i32 = arith.constant 0 : i32
    %c0_i32_0 = arith.constant 0 : i32
    %c0_i32_1 = arith.constant 0 : i32
    return %c0_i32, %c0_i32_0 : i32, i32
  }
  func.func @transform_3(%arg0: i32) -> (i32, i32) {
    %c0_i32 = arith.constant 0 : i32
    %c0_i32_0 = arith.constant 0 : i32
    return %arg0, %c0_i32 : i32, i32
  }
}

</mosaic_0001>

<bundles_post_ra>
// kernel: tpu_custom_call.1
= control target key start
LH: loop header
LB: loop body
LE: loop exit
PB: predicated region body
PF: predicated region fallthrough
CT: control target
= control target key end

     0   :  { %8 = vsyncpa [#allocation3], 0  ;;  %s572_s0 = inlined_call_operand.vmem [shape: f32[16,32], index: 0, kind: input, shape index: {}]   ;;  %s573_s1 = inlined_call_operand.vmem [shape: bf16[32,16], index: 1, kind: input, shape index: {}]   ;;  %s574_s2 = inlined_call_operand.vmem [shape: f32[1,16], index: 2, kind: input, shape index: {}]   ;;  %s575_s3 = inlined_call_operand.hbm [shape: f32[16,16], index: 3, kind: output, shape index: {}]  }
   0x1   :  { %10 = vsyncpa [#allocation3 + $0x1], 0  ;;  %s464_s12 = smov 0   ;;  %s466_s13 = smov 0  }
   0x2   :  { %s468_s14 = smov 0   ;;  %s470_s15 = smov 0  }
   0x3 LB: > { %s485_s16 = sadd.s32 4294967295, %s439_s15   ;;  %s311_s17 = sadd.s32 4294967294, %s439_s15   ;;  %s439_s15 = sphi %s470_s15, %s581_s15   ;;  %s435_s14 = sphi %s468_s14, %s580_s14   ;;  %s431_s13 = sphi %s466_s13, %s579_s13   ;;  %s427_s12 = sphi %s464_s12, %s578_s12  }
   0x4   : > { %s489_s18 = sadd.s32 1, %s439_s15   ;;  %s91_s19 = sadd.s32 1, %s435_s14 }
   0x5   : > { %s88_s20 = ssub.s32 %s439_s15, %s489_s18  ;;  %p101_p0 = scmp.ne.s32.totalorder %s435_s14, %s431_s13 }
   0x6   : > { %p89_p1 = scmp.eq.s32.totalorder %s88_s20, 0  ;;  %p102_p2 = scmp.eq.s32.totalorder %s485_s16, 1 }
   0x7   : > { %p107_p3 = scmp.ne.s32.totalorder %s431_s13, %s427_s12  ;;  %p108_p4 = scmp.eq.s32.totalorder %s311_s17, 1 }
   0x8   : > { %s500_s21 = scalar_select %p89_p1, %s435_s14, %s91_s19  }
   0x9   : > { %p502_p5 = por %p102_p2, %p101_p0  ;;  %p506_p6 = por %p108_p4, %p107_p3 }
   0xa   : > { %p314_p7 = scmp.ge.s32.totalorder %s439_s15, 1  ;;  %p139_p8 = scmp.lt.s32.totalorder %s439_s15, 3 }
   0xc   : > { %p140_p9 = pnand %p314_p7, %p139_p8 }
   0xd   : > { %p162_p10 = scmp.lt.s32.totalorder (!%p140_p9), %s485_s16, 1  ;;  %s159_s6 = sand.u32 (!%p140_p9), 1, %s431_s13  }
   0xe   : > { %143 = sbr.rel (%p140_p9) target bundleno = 237 (0xed), region = 32  ;;  %s315_s7 = sshll.u32 (!%p140_p9), %s159_s6, 3 }
   0xf   : > { %s322_s10 = sshll.u32 (!%p140_p9), %s485_s16, 7  ;;  %s161_s11 = scalar_lea.vmem (!%p140_p9), [#allocation2], %s315_s7 }
  0x10   : > { %s252_s17 = sshll.u32 (!%p140_p9), %s161_s11, 4  ;;  %s531_s24 = scalar_lea.hbm (!%p140_p9), %s575_s3, %s322_s10  ;;  %s533_s17 = int_to_ptr.vmem [resolvable:$true] %s252_s17 }
  0x11   : > { %s239_s25 = scalar_lea.sflag (!%p140_p9), [#allocation3], %s159_s6  ;;  %s443_s26 = smov (!%p140_p9), [#allocation2]  }
  0x12   : > { %s383_s27 = sshll.u32 (!%p140_p9), %s443_s26, 4  ;;  %s384_s27 = int_to_ptr.vmem [resolvable:$false] %s383_s27 }
  0x13   : > { %v377_v0 = vld [vmem:[%s573_s1 + $0x8] sm:$0xff]   ;;  %v441_v1 = vmov 0.0   ;;  %v378_v2 = vld [vmem:[%s573_s1] sm:$0xff]   ;;  %vm442_vm0 = vmmov 0   ;;  %s163_s28 = scalar_select %p162_p10, %s485_s16, 1  ;;  %vm192_vm1 = vcmask 261120  }
  0x14   : > { %328 = vmatprep.subr.bf16.mxu0 %v441_v1  ;;  %332 = vmatprep.mubr.msk.bf16.mxu0 %vm442_vm0, %v441_v1  ;;  %v317_v5 = vld [vmem:[%s574_s2] ss:$0 sm:$0xff]  ;;  %vm236_vm2 = vcmask 130048   ;;  %s379_s16 = scalar_lea.vmem %s533_s17, 128  ;;  %p386_p0 = scmp.lt.s32.totalorder %s533_s17, %s384_s27 }
  0x15   : > { %329 = vmatpush3.bf16.msra.mxu0 %v377_v0  ;;  %s316_s29 = sshll.u32 %s163_s28, 3  ;;  %p380_p11 = scmp.ne.s32.totalorder %s533_s17, %s379_s16 }
  0x16   : > { %330 = vmatprep.subr.bf16.mxu0 %v441_v1  ;;  %s165_s5 = scalar_lea.vmem %s572_s0, %s316_s29  ;;  %s385_s28 = scalar_lea.vmem %s384_s27, 256 }
  0x17   : > { %v167_v3 = vld [vmem:[%s165_s5] sm:$0xff]  ;;  %p381_p12 = pnand %p380_p11, %p502_p5  ;;  %p387_p1 = scmp.lt.s32.totalorder %s385_s28, %s379_s16 }
  0x18   : > { %v168_v4 = vpack.c.bf16 %v167_v3, %v167_v3 }
  0x19   : > { %331 = vmatpush3.bf16.msra.mxu0 %v378_v2  ;;  %p382_p13 = pneg %p381_p12  ;;  %p388_p2 = por %p387_p1, %p386_p0 }
  0x1b   : > { %p389_p3 = pnand %p388_p2, %p382_p13 }
  0x1c   : > { %333 = vmatmul.mubr.msk.bf16.vlgmr.msra.gmra.mxu0 %vm192_vm1, %v168_v4 }
  0xdc   : > { %v230_v6 = vpop.f32.mrf.mxu0 }
  0xdd   : > { %v231_v7 = vadd.f32 %v317_v5, %v230_v6 }
  0xde   : > { %v334_v8 = vpop.f32.mrf.mxu0 }
  0xdf   : > { %237 = vst.msk [vmem:[%s161_s11] sm:$0xff] %vm236_vm2, %v231_v7 }
  0xe0   : > { %v233_v9 = vpop.f32.mrf.mxu0 }
  0xe1   : > { %392 = shalt.err (!%p389_p3)
}
  0xe2   : > { %s393_s29 = scalar_lea.hbm %s531_s24, 128  ;;  %s397_s5 = scalar_lea.hbm %s575_s3, 256 }
  0xe3   : > { %p394_p4 = scmp.ne.s32.totalorder %s531_s24, %s393_s29  ;;  %p398_p9 = scmp.lt.s32.totalorder %s531_s24, %s575_s3 }
  0xe4   : > { %p399_p10 = scmp.lt.s32.totalorder %s397_s5, %s393_s29 }
  0xe5   : > { %p395_p7 = pnand %p394_p4, %p502_p5 }
  0xe6   : > { %p400_p11 = por %p399_p10, %p398_p9 }
  0xe7   : > { %p396_p8 = pneg %p395_p7 }
  0xe9   : > { %p401_p12 = pnand %p400_p11, %p396_p8 }
  0xeb   : > { %404 = shalt.err (!%p401_p12)
}
  0xec   : > { %336 = dma.vmem_to_hbm [thread:$0]  (%p502_p5), %s533_s17, 128, %s531_s24, %s239_s25   ;;  %v335_v10 = vpop.f32.mrf.mxu0 }
  0xed PF: > { %p342_p13 = scmp.ge.s32.totalorder %s439_s15, 2  ;;  %s264_s8 = sand.u32 1, %s427_s12  }
  0xee   : > { %s265_s9 = scalar_lea.sflag [#allocation3], %s264_s8 }
  0xef   : > { %p339_p0 = pnand %p342_p13, %p506_p6 }
  0xf1   : > { %p340_p1 = pneg %p339_p0 }
  0xf3   : > { %422 = dma.done.wait (%p340_p1), %s265_s9, 128  }
  0xf4   : > { %424 = vsyncadd (%p340_p1), %s265_s9, 4294967168  ;;  %p13_p2 = scmp.ge.s32.totalorder %s489_s18, 4   ;;  %s578_s12 = smov %s431_s13 }
  0xf5   : > { %s579_s13 = smov %s435_s14  ;;  %s580_s14 = smov %s500_s21 }
  0xf6   : > { %s581_s15 = smov %s489_s18  ;;  %15 = sbr.rel (!%p13_p2) target bundleno = 3 (0x3), region = 67 }
  0xfb   :  { %270 = vsyncpa [#allocation3], 1 }
  0xfc   :  { %272 = vsyncpa [#allocation3 + $0x1], 1 }

</bundles_post_ra>
